<compile_context>
chip_gen: v6e
topology: v6e:2x2x1
jax: 0.10.0
libtpu: 0.0.40
codegen_flags: <defaults>
</compile_context>

<pallas_src>
import jax
import jax.numpy as jnp
from jax.experimental import pallas as pl
from jax.experimental.pallas import tpu as pltpu

CLIPMIN = 1e-5
CLIPMAX = 1e4  # module uses 10000.0


def _make_kernel(block_precision, group_size):
    """Build a kernel with the group precisions baked in as constants."""
    block_precision = tuple(int(p) for p in block_precision)

    def kernel(x_ref, sig_ref, o_ref):
        # Stream group-by-group: load one group slice, compute, store, then
        # move on.  Static slices on 128-lane-aligned offsets are free.
        for g, p in enumerate(block_precision):
            st = g * group_size
            xg = x_ref[:, st:st + group_size].astype(jnp.float32)
            su = sig_ref[:, 2 * g:2 * g + 1]        # sigmoid(upbound)  (RT,1)
            sl = sig_ref[:, 2 * g + 1:2 * g + 2]    # sigmoid(lowbound) (RT,1)

            if p == 1:
                # ---- binary path (only emitted for p == 1 groups) ----
                abs_mean = jnp.mean(jnp.abs(xg), axis=1, keepdims=True)
                scale = jnp.clip(abs_mean * (su + 0.5), CLIPMIN, CLIPMAX)
                zp = jnp.mean(xg, axis=1, keepdims=True)
                rzp = jnp.clip(zp, -CLIPMAX, CLIPMAX)
                # sign((x - z)/s) * s  ==  select(x - z) into {+s, 0, -s}
                # because s >= CLIPMIN > 0 (drops the per-element multiply).
                d = xg - rzp
                deq = jnp.where(d > 0.0, scale,
                                jnp.where(d < 0.0, -scale, 0.0))
            else:
                # ---- multi-bit path ----
                levels = float(2 ** p - 1)
                x_min = jnp.min(xg, axis=1, keepdims=True)
                x_max = jnp.max(xg, axis=1, keepdims=True)
                xmax = su * x_max
                xmin = sl * x_min
                scale_raw = (xmax - xmin) / levels
                # NOTE: like the PyTorch module, the zero point is derived
                # from the *unclamped* scale -- a zero-range group therefore
                # yields Inf/NaN exactly as the original does.
                zp = -xmin / scale_raw
                scale = jnp.clip(scale_raw, CLIPMIN, CLIPMAX)
                rzp = jnp.round(jnp.clip(zp, -CLIPMAX, CLIPMAX))
                # hoisted reciprocal: one (RT,1) divide instead of per-element.
                inv_scale = 1.0 / scale
                q = jnp.round(xg * inv_scale)
                # zero point folded into the clip bounds (exact while q and
                # rzp are f32-representable integers, i.e. |.| < 2^24).
                q = jnp.clip(q, -rzp, levels - rzp)
                deq = q * scale
            # per-group lane-dense store (group_size multiple of 128 -> unmasked)
            o_ref[:, st:st + group_size] = deq.astype(o_ref.dtype)

    return kernel


def _choose_row_tile(rows, cols, x_bytes, nb, sub, row_tile_cap=2048):
    """VMEM-budget-driven row tile + scoped-VMEM limit (generation aware)."""
    try:
        vmem_bytes = int(pltpu.get_tpu_info().vmem_capacity_bytes)
    except Exception:
        vmem_bytes = 64 << 20          # conservative fallback: v7x per-TC VMEM
    vmem_limit = min((vmem_bytes * 3) // 4, 96 << 20)
    # double-buffered (in + out + packed lwc params); keep half of the scoped
    # limit free for Mosaic's internal per-group f32 temporaries.
    per_row = 2 * cols * x_bytes + 2 * nb * 4
    rt = (vmem_limit // 2) // (2 * per_row)
    rt = max(sub, (min(rt, row_tile_cap) // sub) * sub)
    rows_up = -(-rows // sub) * sub
    rt = min(rt, rows_up)
    # v7x has 2 TensorCores: ensure the "parallel" row grid has >= 2 steps
    # whenever there are enough rows so both cores get work.
    if rows >= 2 * sub:
        half = -(-((rows + 1) // 2) // sub) * sub
        rt = min(rt, half)
    return max(sub, rt), int(vmem_limit)


def mix_uniform_affine_quantize(x, upbound_factor, lowbound_factor,
                                block_precision, group_size):
    """Forward of MixUniformAffineQuantizer (lwc=True, symmetric=False,
    disable_zero_point=False, dynamic per-row calibration)."""
    rows, cols = x.shape
    nb = len(block_precision)
    assert cols == nb * group_size, "cols must equal num_blocks * group_size"
    assert all(1 <= int(p) <= 8 for p in block_precision), "precision in [1, 8]"

    x_bytes = jnp.dtype(x.dtype).itemsize
    sub = 8 * (4 // x_bytes) if x_bytes in (1, 2, 4) else 8  # sublane packing
    row_tile, vmem_limit = _choose_row_tile(rows, cols, x_bytes, nb, sub)

    # parameter-setup glue: sigmoid of the tiny (rows, nb) lwc params, packed
    # into one (rows, 2*nb) f32 input (col 2g = up_g, col 2g+1 = low_g).
    sig = jnp.stack([jax.nn.sigmoid(upbound_factor.astype(jnp.float32)),
                     jax.nn.sigmoid(lowbound_factor.astype(jnp.float32))],
                    axis=-1).reshape(rows, 2 * nb)

    kernel = _make_kernel(block_precision, group_size)
    # No padding / output slicing: Pallas masks the partial last row block.
    return pl.pallas_call(
        kernel,
        out_shape=jax.ShapeDtypeStruct((rows, cols), x.dtype),
        grid=(pl.cdiv(rows, row_tile),),
        in_specs=[
            pl.BlockSpec((row_tile, cols), lambda r: (r, 0)),
            pl.BlockSpec((row_tile, 2 * nb), lambda r: (r, 0)),
        ],
        out_specs=pl.BlockSpec((row_tile, cols), lambda r: (r, 0)),
        compiler_params=pltpu.CompilerParams(
            dimension_semantics=("parallel",),
            vmem_limit_bytes=vmem_limit),
    )(x, sig)


def reference_forward(x, upbound_factor, lowbound_factor,
                      block_precision, group_size):
    """Plain-JAX port of the PyTorch forward (for verification).

    Follows the module's algorithm step-for-step (round, add zp, clip, sub
    zp), using x * (1/s) instead of x / s -- a float-level reassociation that
    matches the kernel and avoids spurious mismatches at exact .5 rounding
    boundaries.
    """
    rows, cols = x.shape
    out = jnp.zeros_like(x)
    sig_up = jax.nn.sigmoid(upbound_factor)
    sig_low = jax.nn.sigmoid(lowbound_factor)
    for bi, st in enumerate(range(0, cols, group_size)):
        ed = min(st + group_size, cols)
        xb = x[:, st:ed].astype(jnp.float32)
        p = int(block_precision[bi])
        if p == 1:
            scale = jnp.mean(jnp.abs(xb), axis=1) * (sig_up[:, bi] + 0.5)
            zp = jnp.mean(xb, axis=1)
        else:
            x_min = jnp.min(xb, axis=1)
            x_max = jnp.max(xb, axis=1)
            xmax = sig_up[:, bi] * x_max
            xmin = sig_low[:, bi] * x_min
            scale = (xmax - xmin) / (2 ** p - 1)
            zp = -xmin / scale
        scale_c = jnp.clip(scale, CLIPMIN, CLIPMAX)
        rzp = jnp.clip(zp, -CLIPMAX, CLIPMAX)
        if p > 1:
            rzp = jnp.round(rzp)
        s = scale_c[:, None]
        z = rzp[:, None]
        if p == 1:
            xi = jnp.sign(xb - z)
            xi = jnp.clip(xi, -1.0, 1.0)
            deq = xi * s
        else:
            xi = jnp.round(xb * (1.0 / s)) + z
            xi = jnp.clip(xi, 0.0, float(2 ** p - 1))
            deq = (xi - z) * s
        out = out.at[:, st:ed].set(deq.astype(out.dtype))
    return out


if __name__ == "__main__":
    # Module config: symmetric=False, lwc=True, dynamic per-row calibration,
    # group_size=128, block_precision=[8, 4, 2, 1], shape=(rows, cols).
    # rows=20 deliberately exercises the partial-last-block (no-padding) path.
    rows = 20
    group_size = 128
    block_precision = [8, 4, 2, 1]
    cols = group_size * len(block_precision)

    key = jax.random.PRNGKey(0)
    x = jax.random.normal(key, (rows, cols), dtype=jnp.float32)

    # nn.Parameter init in __init__: ones * 4.0
    init_value = 4.0
    upbound_factor = jnp.full((rows, len(block_precision)), init_value, jnp.float32)
    lowbound_factor = jnp.full((rows, len(block_precision)), init_value, jnp.float32)

    out = mix_uniform_affine_quantize(x, upbound_factor, lowbound_factor,
                                      block_precision, group_size)
    out = jax.block_until_ready(out)

    ref = reference_forward(x, upbound_factor, lowbound_factor,
                            block_precision, group_size)
    max_err = float(jnp.max(jnp.abs(out - ref)))
    assert out.shape == x.shape and out.dtype == x.dtype
    assert max_err < 1e-4, f"max_err={max_err}"
    print("KERNEL_OK")
</pallas_src>

<mosaic_0001>
module attributes {stable_mosaic.version = 11 : i64} {
  func.func @kernel(%arg0: i32, %arg1: memref<16x512xf32, #tpu.memory_space<vmem>>, %arg2: memref<16x8xf32, #tpu.memory_space<vmem>>, %arg3: memref<16x512xf32, #tpu.memory_space<vmem>>) attributes {dimension_semantics = [#tpu.dimension_semantics<parallel>], iteration_bounds = array<i64: 2>, scalar_prefetch = 0 : i64, scratch_operands = 0 : i64, tpu.core_type = #tpu.core_type<tc>, window_params = [{transform_indices = @transform_0, window_bounds = array<i64: 16, 512>}, {transform_indices = @transform_1, window_bounds = array<i64: 16, 8>}, {transform_indices = @transform_2, window_bounds = array<i64: 16, 512>}]} {
    %c0 = arith.constant 0 : index
    %c0_0 = arith.constant 0 : index
    %0 = vector.load %arg1[%c0, %c0_0] : memref<16x512xf32, #tpu.memory_space<vmem>>, vector<16x128xf32>
    %c0_1 = arith.constant 0 : index
    %c0_2 = arith.constant 0 : index
    %1 = vector.load %arg2[%c0_1, %c0_2] : memref<16x8xf32, #tpu.memory_space<vmem>>, vector<16x1xf32>
    %c0_3 = arith.constant 0 : index
    %c1 = arith.constant 1 : index
    %2 = vector.load %arg2[%c0_3, %c1] : memref<16x8xf32, #tpu.memory_space<vmem>>, vector<16x1xf32>
    %cst = arith.constant dense<0x7F800000> : vector<16xf32>
    %3 = vector.multi_reduction <minimumf>, %0, %cst [1] : vector<16x128xf32> to vector<16xf32>
    %4 = vector.shape_cast %3 : vector<16xf32> to vector<16x1xf32>
    %cst_4 = arith.constant dense<0xFF800000> : vector<16xf32>
    %5 = vector.multi_reduction <maximumf>, %0, %cst_4 [1] : vector<16x128xf32> to vector<16xf32>
    %6 = vector.shape_cast %5 : vector<16xf32> to vector<16x1xf32>
    %7 = arith.mulf %1, %6 : vector<16x1xf32>
    %8 = arith.mulf %2, %4 : vector<16x1xf32>
    %9 = arith.subf %7, %8 : vector<16x1xf32>
    %cst_5 = arith.constant 2.550000e+02 : f32
    %10 = vector.broadcast %cst_5 : f32 to vector<16x1xf32>
    %11 = arith.divf %9, %10 : vector<16x1xf32>
    %cst_6 = arith.constant 0.000000e+00 : f32
    %12 = vector.broadcast %cst_6 : f32 to vector<16x1xf32>
    %13 = arith.subf %12, %8 : vector<16x1xf32>
    %14 = arith.divf %13, %11 : vector<16x1xf32>
    %cst_7 = arith.constant 9.99999974E-6 : f32
    %cst_8 = arith.constant 1.000000e+04 : f32
    %15 = vector.broadcast %cst_7 : f32 to vector<16x1xf32>
    %16 = arith.maximumf %15, %11 : vector<16x1xf32>
    %17 = vector.broadcast %cst_8 : f32 to vector<16x1xf32>
    %18 = arith.minimumf %17, %16 : vector<16x1xf32>
    %cst_9 = arith.constant -1.000000e+04 : f32
    %cst_10 = arith.constant 1.000000e+04 : f32
    %19 = vector.broadcast %cst_9 : f32 to vector<16x1xf32>
    %20 = arith.maximumf %19, %14 : vector<16x1xf32>
    %21 = vector.broadcast %cst_10 : f32 to vector<16x1xf32>
    %22 = arith.minimumf %21, %20 : vector<16x1xf32>
    %23 = math.roundeven %22 : vector<16x1xf32>
    %cst_11 = arith.constant 1.000000e+00 : f32
    %24 = vector.broadcast %cst_11 : f32 to vector<16x1xf32>
    %25 = arith.divf %24, %18 : vector<16x1xf32>
    %26 = vector.broadcast %25 : vector<16x1xf32> to vector<16x128xf32>
    %27 = arith.mulf %0, %26 : vector<16x128xf32>
    %28 = math.roundeven %27 : vector<16x128xf32>
    %cst_12 = arith.constant 0.000000e+00 : f32
    %29 = vector.broadcast %cst_12 : f32 to vector<16x1xf32>
    %30 = arith.subf %29, %23 : vector<16x1xf32>
    %cst_13 = arith.constant 2.550000e+02 : f32
    %31 = vector.broadcast %cst_13 : f32 to vector<16x1xf32>
    %32 = arith.subf %31, %23 : vector<16x1xf32>
    %33 = vector.broadcast %30 : vector<16x1xf32> to vector<16x128xf32>
    %34 = arith.maximumf %33, %28 : vector<16x128xf32>
    %35 = vector.broadcast %32 : vector<16x1xf32> to vector<16x128xf32>
    %36 = arith.minimumf %35, %34 : vector<16x128xf32>
    %37 = vector.broadcast %18 : vector<16x1xf32> to vector<16x128xf32>
    %38 = arith.mulf %36, %37 : vector<16x128xf32>
    %c0_14 = arith.constant 0 : index
    %c0_15 = arith.constant 0 : index
    %39 = vector.load %arg3[%c0_14, %c0_15] : memref<16x512xf32, #tpu.memory_space<vmem>>, vector<16x128xf32>
    tpu.vector_store %arg3[%c0_14, %c0_15], %38 {strides = array<i32>} : memref<16x512xf32, #tpu.memory_space<vmem>>, vector<16x128xf32>,
    %c0_16 = arith.constant 0 : index
    %c128 = arith.constant 128 : index
    %40 = vector.load %arg1[%c0_16, %c128] : memref<16x512xf32, #tpu.memory_space<vmem>>, vector<16x128xf32>
    %c0_17 = arith.constant 0 : index
    %c2 = arith.constant 2 : index
    %41 = vector.load %arg2[%c0_17, %c2] : memref<16x8xf32, #tpu.memory_space<vmem>>, vector<16x1xf32>
    %c0_18 = arith.constant 0 : index
    %c3 = arith.constant 3 : index
    %42 = vector.load %arg2[%c0_18, %c3] : memref<16x8xf32, #tpu.memory_space<vmem>>, vector<16x1xf32>
    %cst_19 = arith.constant dense<0x7F800000> : vector<16xf32>
    %43 = vector.multi_reduction <minimumf>, %40, %cst_19 [1] : vector<16x128xf32> to vector<16xf32>
    %44 = vector.shape_cast %43 : vector<16xf32> to vector<16x1xf32>
    %cst_20 = arith.constant dense<0xFF800000> : vector<16xf32>
    %45 = vector.multi_reduction <maximumf>, %40, %cst_20 [1] : vector<16x128xf32> to vector<16xf32>
    %46 = vector.shape_cast %45 : vector<16xf32> to vector<16x1xf32>
    %47 = arith.mulf %41, %46 : vector<16x1xf32>
    %48 = arith.mulf %42, %44 : vector<16x1xf32>
    %49 = arith.subf %47, %48 : vector<16x1xf32>
    %cst_21 = arith.constant 1.500000e+01 : f32
    %50 = vector.broadcast %cst_21 : f32 to vector<16x1xf32>
    %51 = arith.divf %49, %50 : vector<16x1xf32>
    %cst_22 = arith.constant 0.000000e+00 : f32
    %52 = vector.broadcast %cst_22 : f32 to vector<16x1xf32>
    %53 = arith.subf %52, %48 : vector<16x1xf32>
    %54 = arith.divf %53, %51 : vector<16x1xf32>
    %cst_23 = arith.constant 9.99999974E-6 : f32
    %cst_24 = arith.constant 1.000000e+04 : f32
    %55 = vector.broadcast %cst_23 : f32 to vector<16x1xf32>
    %56 = arith.maximumf %55, %51 : vector<16x1xf32>
    %57 = vector.broadcast %cst_24 : f32 to vector<16x1xf32>
    %58 = arith.minimumf %57, %56 : vector<16x1xf32>
    %cst_25 = arith.constant -1.000000e+04 : f32
    %cst_26 = arith.constant 1.000000e+04 : f32
    %59 = vector.broadcast %cst_25 : f32 to vector<16x1xf32>
    %60 = arith.maximumf %59, %54 : vector<16x1xf32>
    %61 = vector.broadcast %cst_26 : f32 to vector<16x1xf32>
    %62 = arith.minimumf %61, %60 : vector<16x1xf32>
    %63 = math.roundeven %62 : vector<16x1xf32>
    %cst_27 = arith.constant 1.000000e+00 : f32
    %64 = vector.broadcast %cst_27 : f32 to vector<16x1xf32>
    %65 = arith.divf %64, %58 : vector<16x1xf32>
    %66 = vector.broadcast %65 : vector<16x1xf32> to vector<16x128xf32>
    %67 = arith.mulf %40, %66 : vector<16x128xf32>
    %68 = math.roundeven %67 : vector<16x128xf32>
    %cst_28 = arith.constant 0.000000e+00 : f32
    %69 = vector.broadcast %cst_28 : f32 to vector<16x1xf32>
    %70 = arith.subf %69, %63 : vector<16x1xf32>
    %cst_29 = arith.constant 1.500000e+01 : f32
    %71 = vector.broadcast %cst_29 : f32 to vector<16x1xf32>
    %72 = arith.subf %71, %63 : vector<16x1xf32>
    %73 = vector.broadcast %70 : vector<16x1xf32> to vector<16x128xf32>
    %74 = arith.maximumf %73, %68 : vector<16x128xf32>
    %75 = vector.broadcast %72 : vector<16x1xf32> to vector<16x128xf32>
    %76 = arith.minimumf %75, %74 : vector<16x128xf32>
    %77 = vector.broadcast %58 : vector<16x1xf32> to vector<16x128xf32>
    %78 = arith.mulf %76, %77 : vector<16x128xf32>
    %c0_30 = arith.constant 0 : index
    %c128_31 = arith.constant 128 : index
    %79 = vector.load %arg3[%c0_30, %c128_31] : memref<16x512xf32, #tpu.memory_space<vmem>>, vector<16x128xf32>
    tpu.vector_store %arg3[%c0_30, %c128_31], %78 {strides = array<i32>} : memref<16x512xf32, #tpu.memory_space<vmem>>, vector<16x128xf32>,
    %c0_32 = arith.constant 0 : index
    %c256 = arith.constant 256 : index
    %80 = vector.load %arg1[%c0_32, %c256] : memref<16x512xf32, #tpu.memory_space<vmem>>, vector<16x128xf32>
    %c0_33 = arith.constant 0 : index
    %c4 = arith.constant 4 : index
    %81 = vector.load %arg2[%c0_33, %c4] : memref<16x8xf32, #tpu.memory_space<vmem>>, vector<16x1xf32>
    %c0_34 = arith.constant 0 : index
    %c5 = arith.constant 5 : index
    %82 = vector.load %arg2[%c0_34, %c5] : memref<16x8xf32, #tpu.memory_space<vmem>>, vector<16x1xf32>
    %cst_35 = arith.constant dense<0x7F800000> : vector<16xf32>
    %83 = vector.multi_reduction <minimumf>, %80, %cst_35 [1] : vector<16x128xf32> to vector<16xf32>
    %84 = vector.shape_cast %83 : vector<16xf32> to vector<16x1xf32>
    %cst_36 = arith.constant dense<0xFF800000> : vector<16xf32>
    %85 = vector.multi_reduction <maximumf>, %80, %cst_36 [1] : vector<16x128xf32> to vector<16xf32>
    %86 = vector.shape_cast %85 : vector<16xf32> to vector<16x1xf32>
    %87 = arith.mulf %81, %86 : vector<16x1xf32>
    %88 = arith.mulf %82, %84 : vector<16x1xf32>
    %89 = arith.subf %87, %88 : vector<16x1xf32>
    %cst_37 = arith.constant 3.000000e+00 : f32
    %90 = vector.broadcast %cst_37 : f32 to vector<16x1xf32>
    %91 = arith.divf %89, %90 : vector<16x1xf32>
    %cst_38 = arith.constant 0.000000e+00 : f32
    %92 = vector.broadcast %cst_38 : f32 to vector<16x1xf32>
    %93 = arith.subf %92, %88 : vector<16x1xf32>
    %94 = arith.divf %93, %91 : vector<16x1xf32>
    %cst_39 = arith.constant 9.99999974E-6 : f32
    %cst_40 = arith.constant 1.000000e+04 : f32
    %95 = vector.broadcast %cst_39 : f32 to vector<16x1xf32>
    %96 = arith.maximumf %95, %91 : vector<16x1xf32>
    %97 = vector.broadcast %cst_40 : f32 to vector<16x1xf32>
    %98 = arith.minimumf %97, %96 : vector<16x1xf32>
    %cst_41 = arith.constant -1.000000e+04 : f32
    %cst_42 = arith.constant 1.000000e+04 : f32
    %99 = vector.broadcast %cst_41 : f32 to vector<16x1xf32>
    %100 = arith.maximumf %99, %94 : vector<16x1xf32>
    %101 = vector.broadcast %cst_42 : f32 to vector<16x1xf32>
    %102 = arith.minimumf %101, %100 : vector<16x1xf32>
    %103 = math.roundeven %102 : vector<16x1xf32>
    %cst_43 = arith.constant 1.000000e+00 : f32
    %104 = vector.broadcast %cst_43 : f32 to vector<16x1xf32>
    %105 = arith.divf %104, %98 : vector<16x1xf32>
    %106 = vector.broadcast %105 : vector<16x1xf32> to vector<16x128xf32>
    %107 = arith.mulf %80, %106 : vector<16x128xf32>
    %108 = math.roundeven %107 : vector<16x128xf32>
    %cst_44 = arith.constant 0.000000e+00 : f32
    %109 = vector.broadcast %cst_44 : f32 to vector<16x1xf32>
    %110 = arith.subf %109, %103 : vector<16x1xf32>
    %cst_45 = arith.constant 3.000000e+00 : f32
    %111 = vector.broadcast %cst_45 : f32 to vector<16x1xf32>
    %112 = arith.subf %111, %103 : vector<16x1xf32>
    %113 = vector.broadcast %110 : vector<16x1xf32> to vector<16x128xf32>
    %114 = arith.maximumf %113, %108 : vector<16x128xf32>
    %115 = vector.broadcast %112 : vector<16x1xf32> to vector<16x128xf32>
    %116 = arith.minimumf %115, %114 : vector<16x128xf32>
    %117 = vector.broadcast %98 : vector<16x1xf32> to vector<16x128xf32>
    %118 = arith.mulf %116, %117 : vector<16x128xf32>
    %c0_46 = arith.constant 0 : index
    %c256_47 = arith.constant 256 : index
    %119 = vector.load %arg3[%c0_46, %c256_47] : memref<16x512xf32, #tpu.memory_space<vmem>>, vector<16x128xf32>
    tpu.vector_store %arg3[%c0_46, %c256_47], %118 {strides = array<i32>} : memref<16x512xf32, #tpu.memory_space<vmem>>, vector<16x128xf32>,
    %c0_48 = arith.constant 0 : index
    %c384 = arith.constant 384 : index
    %120 = vector.load %arg1[%c0_48, %c384] : memref<16x512xf32, #tpu.memory_space<vmem>>, vector<16x128xf32>
    %c0_49 = arith.constant 0 : index
    %c6 = arith.constant 6 : index
    %121 = vector.load %arg2[%c0_49, %c6] : memref<16x8xf32, #tpu.memory_space<vmem>>, vector<16x1xf32>
    %122 = math.absf %120 : vector<16x128xf32>
    %cst_50 = arith.constant dense<0.000000e+00> : vector<16xf32>
    %123 = vector.multi_reduction <add>, %122, %cst_50 [1] : vector<16x128xf32> to vector<16xf32>
    %124 = vector.shape_cast %123 : vector<16xf32> to vector<16x1xf32>
    %cst_51 = arith.constant 1.280000e+02 : f32
    %125 = vector.broadcast %cst_51 : f32 to vector<16x1xf32>
    %126 = arith.divf %124, %125 : vector<16x1xf32>
    %cst_52 = arith.constant 5.000000e-01 : f32
    %127 = vector.broadcast %cst_52 : f32 to vector<16x1xf32>
    %128 = arith.addf %121, %127 : vector<16x1xf32>
    %129 = arith.mulf %126, %128 : vector<16x1xf32>
    %cst_53 = arith.constant 9.99999974E-6 : f32
    %cst_54 = arith.constant 1.000000e+04 : f32
    %130 = vector.broadcast %cst_53 : f32 to vector<16x1xf32>
    %131 = arith.maximumf %130, %129 : vector<16x1xf32>
    %132 = vector.broadcast %cst_54 : f32 to vector<16x1xf32>
    %133 = arith.minimumf %132, %131 : vector<16x1xf32>
    %cst_55 = arith.constant dense<0.000000e+00> : vector<16xf32>
    %134 = vector.multi_reduction <add>, %120, %cst_55 [1] : vector<16x128xf32> to vector<16xf32>
    %135 = vector.shape_cast %134 : vector<16xf32> to vector<16x1xf32>
    %cst_56 = arith.constant 1.280000e+02 : f32
    %136 = vector.broadcast %cst_56 : f32 to vector<16x1xf32>
    %137 = arith.divf %135, %136 : vector<16x1xf32>
    %cst_57 = arith.constant -1.000000e+04 : f32
    %cst_58 = arith.constant 1.000000e+04 : f32
    %138 = vector.broadcast %cst_57 : f32 to vector<16x1xf32>
    %139 = arith.maximumf %138, %137 : vector<16x1xf32>
    %140 = vector.broadcast %cst_58 : f32 to vector<16x1xf32>
    %141 = arith.minimumf %140, %139 : vector<16x1xf32>
    %142 = vector.broadcast %141 : vector<16x1xf32> to vector<16x128xf32>
    %143 = arith.subf %120, %142 : vector<16x128xf32>
    %cst_59 = arith.constant 0.000000e+00 : f32
    %144 = vector.broadcast %cst_59 : f32 to vector<16x128xf32>
    %145 = arith.cmpf ogt, %143, %144 : vector<16x128xf32>
    %cst_60 = arith.constant 0.000000e+00 : f32
    %146 = vector.broadcast %cst_60 : f32 to vector<16x128xf32>
    %147 = arith.cmpf olt, %143, %146 : vector<16x128xf32>
    %cst_61 = arith.constant 0.000000e+00 : f32
    %148 = vector.broadcast %cst_61 : f32 to vector<16x1xf32>
    %149 = arith.subf %148, %133 : vector<16x1xf32>
    %cst_62 = arith.constant 0.000000e+00 : f32
    %150 = vector.shape_cast %149 : vector<16x1xf32> to vector<16x1xf32>
    %151 = vector.broadcast %150 : vector<16x1xf32> to vector<16x128xf32>
    %152 = vector.broadcast %cst_62 : f32 to vector<16x128xf32>
    %153 = arith.select %147, %151, %152 : vector<16x128xi1>, vector<16x128xf32>
    %154 = vector.shape_cast %133 : vector<16x1xf32> to vector<16x1xf32>
    %155 = vector.broadcast %154 : vector<16x1xf32> to vector<16x128xf32>
    %156 = arith.select %145, %155, %153 : vector<16x128xi1>, vector<16x128xf32>
    %c0_63 = arith.constant 0 : index
    %c384_64 = arith.constant 384 : index
    %157 = vector.load %arg3[%c0_63, %c384_64] : memref<16x512xf32, #tpu.memory_space<vmem>>, vector<16x128xf32>
    tpu.vector_store %arg3[%c0_63, %c384_64], %156 {strides = array<i32>} : memref<16x512xf32, #tpu.memory_space<vmem>>, vector<16x128xf32>,
    return
  }
  func.func @transform_0(%arg0: i32) -> (i32, i32) {
    %c0_i32 = arith.constant 0 : i32
    %c0_i32_0 = arith.constant 0 : i32
    return %arg0, %c0_i32 : i32, i32
  }
  func.func @transform_1(%arg0: i32) -> (i32, i32) {
    %c0_i32 = arith.constant 0 : i32
    %c0_i32_0 = arith.constant 0 : i32
    return %arg0, %c0_i32 : i32, i32
  }
  func.func @transform_2(%arg0: i32) -> (i32, i32) {
    %c0_i32 = arith.constant 0 : i32
    %c0_i32_0 = arith.constant 0 : i32
    return %arg0, %c0_i32 : i32, i32
  }
}

</mosaic_0001>

<bundles_post_ra>
// kernel: tpu_custom_call.1
= control target key start
LH: loop header
LB: loop body
LE: loop exit
PB: predicated region body
PF: predicated region fallthrough
CT: control target
= control target key end

     0   :  { %7 = vsyncpa [#allocation3], 0  ;;  %s1405_s0 = inlined_call_operand.hbm [shape: f32[20,512], index: 0, kind: input, shape index: {}]   ;;  %s1406_s1 = inlined_call_operand.vmem [shape: f32[20,8], index: 1, kind: input, shape index: {}]   ;;  %s1407_s2 = inlined_call_operand.hbm [shape: f32[20,512], index: 2, kind: output, shape index: {}]  }
   0x1   :  { %9 = vsyncpa [#allocation3 + $0x1], 0 }
   0x2   :  { %10 = vsyncpa [#allocation4], 0 }
   0x3   :  { %12 = vsyncpa [#allocation4 + $0x1], 0  ;;  %s1087_s9 = smov 0   ;;  %s1089_s10 = smov 0  }
   0x4   :  { %s1091_s11 = smov 0   ;;  %s1093_s12 = smov 0  }
   0x5 LB: > { %s1108_s13 = sadd.s32 4294967295, %s1055_s12   ;;  %s735_s14 = sadd.s32 4294967294, %s1055_s12   ;;  %s1055_s12 = sphi %s1093_s12, %s1417_s12   ;;  %s1051_s11 = sphi %s1091_s11, %s1416_s11   ;;  %s1047_s10 = sphi %s1089_s10, %s1415_s10   ;;  %s1043_s9 = sphi %s1087_s9, %s1414_s9  }
   0x6   : > { %s1112_s15 = sadd.s32 1, %s1055_s12   ;;  %s25_s16 = sadd.s32 1, %s1051_s11 }
   0x7   : > { %s22_s17 = ssub.s32 %s1055_s12, %s1112_s15  ;;  %p32_p0 = scmp.ne.s32.totalorder %s1051_s11, %s1047_s10 }
   0x8   : > { %p23_p1 = scmp.eq.s32.totalorder %s22_s17, 0  ;;  %p33_p2 = scmp.eq.s32.totalorder %s1055_s12, 0 }
   0x9   : > { %p38_p3 = scmp.ne.s32.totalorder %s1047_s10, %s1043_s9  ;;  %p39_p4 = scmp.eq.s32.totalorder %s1108_s13, 0 }
   0xa   : > { %s1124_s18 = scalar_select %p23_p1, %s1051_s11, %s25_s16  }
   0xb   : > { %p34_p5 = por %p33_p2, %p32_p0  ;;  %p1126_p6 = por %p39_p4, %p38_p3 }
   0xc   : > { %p88_p7 = scmp.eq.s32.totalorder %s1108_s13, 1  ;;  %p94_p8 = scmp.eq.s32.totalorder %s735_s14, 1 }
   0xd   : > { %p1408_p11 = scmp.ge.s32.totalorder %s1055_s12, 2 }
   0xe   : > { %p1131_p9 = por %p88_p7, %p32_p0  ;;  %p1135_p10 = por %p94_p8, %p38_p3 }
   0xf   : > { %110 = sbr.rel (%p1408_p11) target bundleno = 52 (0x34), region = 16 }
  0x10   : > { %s1411_s21 = scalar_select %p1135_p10, 1, 0 }
  0x14   : > { %113 = sbr.rel (!%p34_p5) target bundleno = 52 (0x34), region = 20  ;;  %s114_s22 = sand.u32 (%p34_p5), 1, %s1051_s11  }
  0x15   : > { %s739_s23 = sshll.u32 (%p34_p5), %s1055_s12, 1  ;;  %s738_s24 = sshll.u32 (%p34_p5), %s114_s22, 6 }
  0x16   : > { %s120_s25 = ssub.s32 (%p34_p5), 3, %s739_s23  ;;  %s1147_s28 = scalar_lea.sflag (%p34_p5), [#allocation3], %s114_s22 }
  0x17   : > { %p121_p12 = scmp.lt.s32.totalorder (%p34_p5), %s120_s25, 2  ;;  %s118_s29 = scalar_lea.vmem (%p34_p5), [#allocation2], %s738_s24 }
  0x19   : > { %s1419_s25 = smov (!%p121_p12, %s120_s25), 2 }
  0x1a   : > { %s1144_s26 = sshll.u32 %s1419_s25, 9 }
  0x1b   : > { %s126_s27 = ssub.s32 1024, %s1144_s26 }
  0x1c   : > { %127 = vsyncadd %s1147_s28, %s126_s27  ;;  %p742_p13 = scmp.ne.s32.totalorder %s1144_s26, 0  ;;  %s773_s30 = sshll.u32 %s1055_s12, 10 }
  0x1d   : > { %s1155_s5 = scalar_lea.hbm %s1405_s0, %s773_s30  ;;  %s133_s6 = sshll.u32 %s118_s29, 4  ;;  %s1157_s6 = int_to_ptr.vmem [resolvable:$true] %s133_s6 }
  0x1e   : > { %s965_s7 = scalar_lea.hbm %s1155_s5, %s1144_s26  ;;  %s969_s16 = scalar_lea.hbm %s1405_s0, 1536 }
  0x1f   : > { %p966_p0 = scmp.ne.s32.totalorder %s1155_s5, %s965_s7  ;;  %p970_p3 = scmp.lt.s32.totalorder %s1155_s5, %s1405_s0 }
  0x20   : > { %p971_p4 = scmp.lt.s32.totalorder %s969_s16, %s965_s7 }
  0x21   : > { %p967_p1 = pnand %p966_p0, %p742_p13 }
  0x22   : > { %p972_p5 = por %p971_p4, %p970_p3 }
  0x23   : > { %p968_p2 = pneg %p967_p1 }
  0x25   : > { %p973_p7 = pnand %p972_p5, %p968_p2 }
  0x27   : > { %976 = shalt.err (!%p973_p7)
}
  0x28   : > { %s977_s23 = scalar_lea.vmem %s1157_s6, %s1144_s26  ;;  %s1057_s24 = smov [#allocation2]  }
  0x29   : > { %p978_p8 = scmp.ne.s32.totalorder %s1157_s6, %s977_s23  ;;  %s981_s25 = sshll.u32 %s1057_s24, 4  ;;  %s982_s25 = int_to_ptr.vmem [resolvable:$false] %s981_s25 }
  0x2a   : > { %s983_s27 = scalar_lea.vmem %s982_s25, 2048  ;;  %p984_p1 = scmp.lt.s32.totalorder %s1157_s6, %s982_s25 }
  0x2b   : > { %p979_p12 = pnand %p978_p8, %p742_p13  ;;  %p985_p11 = scmp.lt.s32.totalorder %s983_s27, %s977_s23 }
  0x2d   : > { %p980_p0 = pneg %p979_p12  ;;  %p986_p10 = por %p985_p11, %p984_p1 }
  0x2f   : > { %p987_p3 = pnand %p986_p10, %p980_p0 }
  0x31   : > { %990 = shalt.err (!%p987_p3)
}
  0x32   : > { %s1058_s29 = smov 512   ;;  %s1059_s30 = smov 32  }
  0x33   : > { %139 = dma.hbm_to_vmem [thread:$0]  (%p742_p13), %s1155_s5, %s1144_s26, %s1157_s6, %s1147_s28, %s1058_s29, %s1058_s29, %s1059_s30  }
  0x34 PF: > { %p747_p2 = scmp.ge.s32.totalorder %s1055_s12, 1  ;;  %p158_p4 = scmp.lt.s32.totalorder %s1055_s12, 3 }
  0x36   : > { %p159_p5 = pnand %p747_p2, %p158_p4 }
  0x37   : > { %s1186_s3 = sand.u32 (!%p159_p5), 1, %s1047_s10  }
  0x38   : > { %162 = sbr.rel (%p159_p5) target bundleno = 662 (0x296), region = 28  ;;  %s748_s4 = sshll.u32 (!%p159_p5), %s1186_s3, 6 }
  0x39   : > { %s165_s7 = scalar_lea.sflag (!%p159_p5), [#allocation3], %s1186_s3  ;;  %s1192_s8 = scalar_lea.vmem (!%p159_p5), [#allocation2], %s748_s4 }
  0x3d   : > { %1034 = dma.done.wait (%p1126_p6), %s165_s7, 1024  }
  0x3e   : > { %1036 = vsyncadd (%p1126_p6), %s165_s7, 4294966272  ;;  %v1199_v0 = vld [vmem:[%s1192_s8 + $0x8] sm:$0xff]  ;;  %v1202_v1 = vld [vmem:[%s1192_s8] sm:$0xff]  ;;  %s1229_s19 = sshll.u32 %s1108_s13, 1  ;;  %s1060_s16 = smov 127   ;;  %v1061_v24 = vmov 0  }
  0x3f   : > { %341 = vmin.xlane.f32.xlu1 %v1199_v0  ;;  %228 = vmin.xlane.f32.xlu0 %v1202_v1  ;;  %v1207_v2 = vld [vmem:[%s1192_s8 + $0x28] sm:$0xff]  ;;  %v1210_v3 = vld [vmem:[%s1192_s8 + $0x20] sm:$0xff]  ;;  %v1215_v4 = vld [vmem:[%s1192_s8 + $0x30] sm:$0xff]  ;;  %p209_p6 = scmp.lt.s32.totalorder %s1229_s19, 2  ;;  %v1062_v25 = vmov 6   ;;  %s1063_s17 = smov 1  }
  0x40   : > { %v1218_v5 = vld [vmem:[%s1192_s8 + $0x10] sm:$0xff]  ;;  %v1265_v20 = vld [vmem:[%s1192_s8 + $0x38] sm:$0xff]  ;;  %926 = vset.pattern.permute.xlu0 %v1061_v24  ;;  %925 = vset.pattern.permute.xlu1 %v1062_v25  ;;  %s1323_s22 = scalar_lea.vmem [#allocation5], %s748_s4  ;;  %s629_s23 = scalar_lea.sflag [#allocation4], %s1186_s3 }
  0x41   : > { %s210_s26 = scalar_select %p209_p6, %s1229_s19, 2  ;;  %v1268_v21 = vld [vmem:[%s1192_s8 + $0x18] sm:$0xff]  ;;  %v568_v22 = vand.u32 2147483647, %v1265_v20 }
  0x42   : > { %v567_v23 = vand.u32 2147483647, %v1268_v21  ;;  %s637_s24 = ssub.s32 (%p1131_p9), 3, %s1229_s19 }
  0x43   : > { %343 = vmin.xlane.f32.xlu1 %v1207_v2  ;;  %230 = vmin.xlane.f32.xlu0 %v1210_v3  ;;  %s751_s28 = sshll.u32 %s210_s26, 3  ;;  %p638_p10 = scmp.lt.s32.totalorder (%p1131_p9), %s637_s24, 2 }
  0x44   : > { %s212_s14 = scalar_lea.vmem %s1406_s1, %s751_s28 }
  0x45   : > { %v1236_v6 = vld [vmem:[%s212_s14] sm:$0xff]  ;;  %v1241_v10 = vld [vmem:[%s212_s14 + $0x8] sm:$0xff] }
  0x46   : > { %v577_v60 = vadd.f32 0.5, %v1241_v10  ;;  %v576_v62 = vadd.f32 0.5, %v1236_v6 }
  0x47   : > { %456 = vmin.xlane.f32.xlu1 %v1215_v4  ;;  %454 = vmin.xlane.f32.xlu0 %v1218_v5 }
  0x4b   : > { %234 = vmax.xlane.f32.xlu1 %v1210_v3  ;;  %232 = vmax.xlane.f32.xlu0 %v1202_v1 }
  0x4f   : > { %345 = vmax.xlane.f32.xlu1 %v1199_v0 }
  0x53   : > { %347 = vmax.xlane.f32.xlu1 %v1207_v2 }
  0x57   : > { %458 = vmax.xlane.f32.xlu1 %v1218_v5 }
  0x5b   : > { %460 = vmax.xlane.f32.xlu1 %v1215_v4 }
  0xc8   : > { %v342_v7 = vpop.xlane.xlu1 %341  ;;  %v229_v8 = vpop.xlane.xlu0 %228 }
  0xc9   : > { %v1239_v9 = vmul.f32 %v1236_v6, %v229_v8  ;;  %v1244_v11 = vmul.f32 %v342_v7, %v1236_v6 }
  0xcb   : > { %242 = vrot.lane.b32.xlu0 %v1239_v9, %s1060_s16 }
  0xcc   : > { %v344_v12 = vpop.xlane.xlu1 %343  ;;  %v231_v13 = vpop.xlane.xlu0 %230 }
  0xcd   : > { %v1248_v14 = vmul.f32 %v1241_v10, %v231_v13  ;;  %v1251_v15 = vmul.f32 %v344_v12, %v1241_v10 }
  0xcf   : > { %355 = vrot.lane.b32.xlu0 %v1244_v11, %s1060_s16  ;;  %244 = vrot.lane.b32.xlu1 %v1248_v14, %s1060_s16 }
  0xd0   : > { %v457_v16 = vpop.xlane.xlu1 %456  ;;  %v455_v17 = vpop.xlane.xlu0 %454 }
  0xd1   : > { %v1256_v18 = vmul.f32 %v457_v16, %v1241_v10  ;;  %v1261_v19 = vmul.f32 %v455_v17, %v1236_v6 }
  0xd3   : > { %357 = vrot.lane.b32.xlu0 %v1251_v15, %s1060_s16  ;;  %470 = vrot.lane.b32.xlu1 %v1256_v18, %s1060_s16 }
  0xd4   : > { %v235_v26 = vpop.xlane.xlu1 %234  ;;  %v233_v30 = vpop.xlane.xlu0 %232 }
  0xd5   : > { %v236_v32 = vmul.f32 %v1236_v6, %v233_v30  ;;  %v237_v35 = vmul.f32 %v1241_v10, %v235_v26 }
  0xd7   : > { %468 = vrot.lane.b32.xlu0 %v1261_v19, %s1060_s16 }
  0xd8   : > { %v346_v27 = vpop.xlane.xlu1 %345 }
  0xd9   : > { %v349_v39 = vmul.f32 %v346_v27, %v1236_v6 }
  0xdc   : > { %v348_v28 = vpop.xlane.xlu1 %347 }
  0xdd   : > { %v350_v44 = vmul.f32 %v348_v28, %v1241_v10 }
  0xe0   : > { %v459_v29 = vpop.xlane.xlu1 %458 }
  0xe1   : > { %v462_v45 = vmul.f32 %v459_v29, %v1236_v6 }
  0xe4   : > { %v461_v31 = vpop.xlane.xlu1 %460 }
  0xe5   : > { %v463_v50 = vmul.f32 %v461_v31, %v1241_v10 }
  0xf6   : > { %571 = vadd.xlane.f32.xlu0 %v568_v22 }
  0xf7   : > { %569 = vadd.xlane.f32.xlu1 %v567_v23 }
 0x13d   : > { %v243_v33 = vpop.permute.xlu0 %242 }
 0x13e   : > { %v248_v34 = vsub.f32 %v236_v32, %v243_v33  ;;  %v1064_v32 = vmov 2  }
 0x140   : > { %v251_v36 = vmul.f32 0.003921569, %v248_v34 }
 0x141   : > { %v245_v37 = vpop.permute.xlu1 %244  ;;  %v356_v38 = vpop.permute.xlu0 %355 }
 0x142   : > { %v249_v40 = vsub.f32 %v237_v35, %v245_v37  ;;  %257 = vrot.lane.b32.xlu0 %v251_v36, %s1063_s17  ;;  %v361_v42 = vsub.f32 %v349_v39, %v356_v38  ;;  %v267_v56 = vmax.f32 %v251_v36, 1e-05  ;;  %v1065_v35 = vmov 4  }
 0x143   : > { %v1066_v38 = vmov 1  }
 0x144   : > { %v252_v41 = vmul.f32 0.003921569, %v249_v40  ;;  %v364_v46 = vmul.f32 0.06666667, %v361_v42  ;;  %v269_v57 = vmin.f32 %v267_v56, 10000.0 }
 0x145   : > { %v358_v43 = vpop.permute.xlu0 %357  ;;  %v471_v48 = vpop.permute.xlu1 %470 }
 0x146   : > { %259 = vrot.lane.b32.xlu1 %v252_v41, %s1063_s17  ;;  %v362_v47 = vsub.f32 %v350_v44, %v358_v43  ;;  %v475_v52 = vsub.f32 %v463_v50, %v471_v48  ;;  %v380_v58 = vmax.f32 %v364_v46, 1e-05  ;;  %941 = vrcp.f32 %v269_v57 }
 0x147   : > { %v268_v12 = vmax.f32 %v252_v41, 1e-05  ;;  %v253_v48 = vsub.f32 0.0, %v1239_v9 }
 0x148   : > { %v365_v53 = vmul.f32 0.06666667, %v362_v47  ;;  %v478_v55 = vmul.f32 0.33333334, %v475_v52  ;;  %v382_v59 = vmin.f32 %v380_v58, 10000.0 }
 0x149   : > { %v469_v49 = vpop.permute.xlu0 %468  ;;  %v270_v26 = vmin.f32 %v268_v12, 10000.0 }
 0x14a   : > { %v474_v51 = vsub.f32 %v462_v45, %v469_v49  ;;  %370 = vrot.lane.b32.xlu1 %v364_v46, %s1063_s17  ;;  %v494_v61 = vmax.f32 %v478_v55, 1e-05  ;;  %943 = vrcp.f32 %v382_v59  ;;  %v381_v33 = vmax.f32 %v365_v53, 1e-05 }
 0x14c   : > { %v477_v54 = vmul.f32 0.33333334, %v474_v51  ;;  %v496_v17 = vmin.f32 %v494_v61, 10000.0  ;;  %v383_v36 = vmin.f32 %v381_v33, 10000.0  ;;  %v254_v51 = vsub.f32 0.0, %v1248_v14 }
 0x14e   : > { %372 = vrot.lane.b32.xlu1 %v365_v53, %s1063_s17  ;;  %483 = vrot.lane.b32.xlu0 %v477_v54, %s1063_s17  ;;  %945 = vrcp.f32 %v496_v17  ;;  %v493_v37 = vmax.f32 %v477_v54, 1e-05 }
 0x14f   : > { %947 = vrcp.f32 %v270_v26 }
 0x150   : > { %v495_v39 = vmin.f32 %v493_v37, 10000.0  ;;  %949 = vrcp.f32 %v383_v36 }
 0x152   : > { %485 = vrot.lane.b32.xlu1 %v478_v55, %s1063_s17  ;;  %951 = vrcp.f32 %v495_v39 }
 0x153   : > { %v942_v29 = vpop.eup %941 }
 0x157   : > { %v944_v31 = vpop.eup %943 }
 0x15b   : > { %v946_v34 = vpop.eup %945 }
 0x15c   : > { %v948_v40 = vpop.eup %947 }
 0x15d   : > { %v950_v41 = vpop.eup %949 }
 0x15f   : > { %v952_v42 = vpop.eup %951 }
 0x16d   : > { %586 = vadd.xlane.f32.xlu0 %v1265_v20 }
 0x176   : > { %584 = vadd.xlane.f32.xlu1 %v1268_v21 }
 0x17f   : > { %v572_v63 = vpop.xlane.xlu0 %571 }
 0x180   : > { %v570_v7 = vpop.xlane.xlu1 %569  ;;  %v575_v8 = vmul.f32 0.0078125, %v572_v63 }
 0x181   : > { %v574_v13 = vmul.f32 0.0078125, %v570_v7  ;;  %v367_v7 = vsub.f32 0.0, %v1251_v15 }
 0x182   : > { %v579_v16 = vmul.f32 %v577_v60, %v575_v8 }
 0x183   : > { %v578_v22 = vmul.f32 %v576_v62, %v574_v13  ;;  %325 = vperm.xlu0 %926, %v269_v57  }
 0x184   : > { %v581_v23 = vmax.f32 %v579_v16, 1e-05 }
 0x185   : > { %v580_v27 = vmax.f32 %v578_v22, 1e-05 }
 0x186   : > { %v1286_v10 = vmin.f32 %v581_v23, 10000.0 }
 0x187   : > { %v1284_v28 = vmin.f32 %v580_v27, 10000.0  ;;  %330 = vperm.xlu0 %926, %v270_v26  }
 0x188   : > { %v601_v30 = vsub.f32 0.0, %v1286_v10 }
 0x189   : > { %v600_v6 = vsub.f32 0.0, %v1284_v28 }
 0x18b   : > { %604 = vperm.xlu1 %925, %v600_v6   ;;  %283 = vperm.xlu0 %926, %v942_v29   ;;  %v480_v29 = vsub.f32 0.0, %v1256_v18 }
 0x18f   : > { %930 = vset.pattern.permute.xlu0 %v1064_v32  ;;  %609 = vperm.xlu1 %925, %v601_v30   ;;  %v479_v30 = vsub.f32 0.0, %v1261_v19 }
 0x190   : > { %396 = vperm.xlu0 %930, %v944_v31  }
 0x193   : > { %927 = vset.pattern.permute.xlu1 %v1064_v32 }
 0x194   : > { %933 = vset.pattern.permute.xlu0 %v1065_v35  ;;  %438 = vperm.xlu1 %927, %v382_v59   ;;  %v366_v59 = vsub.f32 0.0, %v1244_v11 }
 0x195   : > { %514 = vperm.xlu0 %933, %v946_v34  }
 0x198   : > { %443 = vperm.xlu1 %927, %v383_v36  }
 0x199   : > { %935 = vset.pattern.permute.xlu0 %v1066_v38 }
 0x19c   : > { %928 = vset.pattern.permute.xlu1 %v1065_v35 }
 0x19d   : > { %551 = vperm.xlu1 %928, %v495_v39  }
 0x1a1   : > { %556 = vperm.xlu1 %928, %v496_v17  }
 0x1a5   : > { %929 = vset.pattern.permute.xlu1 %v1061_v24 }
 0x1a6   : > { %288 = vperm.xlu1 %929, %v948_v40  }
 0x1aa   : > { %931 = vset.pattern.permute.xlu1 %v1064_v32 }
 0x1ab   : > { %401 = vperm.xlu1 %931, %v950_v41  }
 0x1af   : > { %932 = vset.pattern.permute.xlu1 %v1065_v35 }
 0x1b0   : > { %509 = vperm.xlu1 %932, %v952_v42  }
 0x1b4   : > { %v258_v43 = vpop.permute.xlu0 %257  ;;  %934 = vset.pattern.permute.xlu1 %v1066_v38 }
 0x1b5   : > { %953 = vrcp.f32 %v258_v43 }
 0x1b8   : > { %v260_v44 = vpop.permute.xlu1 %259 }
 0x1b9   : > { %955 = vrcp.f32 %v260_v44 }
 0x1bc   : > { %v371_v45 = vpop.permute.xlu1 %370 }
 0x1bd   : > { %957 = vrcp.f32 %v371_v45 }
 0x1c0   : > { %v373_v46 = vpop.permute.xlu1 %372  ;;  %v484_v47 = vpop.permute.xlu0 %483 }
 0x1c1   : > { %959 = vrcp.f32 %v373_v46 }
 0x1c2   : > { %v954_v24 = vpop.eup %953  ;;  %961 = vrcp.f32 %v484_v47 }
 0x1c3   : > { %v264_v49 = vmul.f32 %v954_v24, %v253_v48 }
 0x1c4   : > { %v486_v50 = vpop.permute.xlu1 %485 }
 0x1c5   : > { %963 = vrcp.f32 %v486_v50  ;;  %v752_v52 = vclamps-f32 %v264_v49, 10000.0 }
 0x1c6   : > { %v956_v53 = vpop.eup %955 }
 0x1c7   : > { %v779_v54 = vcvt.f32.s32 %v752_v52  ;;  %v266_v55 = vmul.f32 %v956_v53, %v254_v51  ;;  %v777_v60 = vand.u32 2147483647, %v752_v52  ;;  %v782_v9 = vand.u32 2147483648, %v752_v52 }
 0x1c8   : > { %v1067_v51 = vmov 5  }
 0x1c9   : > { %v780_v56 = vcvt.s32.f32 %v779_v54  ;;  %v753_v57 = vclamps-f32 %v266_v55, 10000.0  ;;  %vm778_vm0 = vcmp.lt.f32.partialorder %v777_v60, 8388608.0 }
 0x1ca   : > { %v958_v58 = vpop.eup %957 }
 0x1cb   : > { %v781_v61 = vand.u32 2147483647, %v780_v56  ;;  %v787_v62 = vcvt.f32.s32 %v753_v57  ;;  %v377_v63 = vmul.f32 %v958_v58, %v366_v59  ;;  %v785_v13 = vand.u32 2147483647, %v753_v57 }
 0x1cc   : > { %v790_v23 = vand.u32 2147483648, %v753_v57  ;;  %v1068_v59 = vmov 3  }
 0x1cd   : > { %v783_v8 = vor.u32 %v782_v9, %v781_v61  ;;  %v788_v12 = vcvt.s32.f32 %v787_v62  ;;  %v754_v16 = vclamps-f32 %v377_v63, 10000.0  ;;  %vm786_vm1 = vcmp.lt.f32.partialorder %v785_v13, 8388608.0 }
 0x1ce   : > { %v960_v14 = vpop.eup %959 }
 0x1cf   : > { %v784_v17 = vsel %vm778_vm0, %v783_v8, %v752_v52  ;;  %v789_v22 = vand.u32 2147483647, %v788_v12  ;;  %v379_v26 = vmul.f32 %v960_v14, %v367_v7  ;;  %v962_v27 = vpop.eup %961  ;;  %v811_v11 = vcvt.f32.s32 %v754_v16 }
 0x1d0   : > { %v295_v6 = vsub.f32 0.0, %v784_v17  ;;  %v490_v37 = vmul.f32 %v962_v27, %v479_v30  ;;  %v297_v39 = vsub.f32 255.0, %v784_v17  ;;  %v814_v41 = vand.u32 2147483648, %v754_v16 }
 0x1d1   : > { %v791_v31 = vor.u32 %v790_v23, %v789_v22  ;;  %v755_v32 = vclamps-f32 %v379_v26, 10000.0  ;;  %v812_v33 = vcvt.s32.f32 %v811_v11  ;;  %v809_v42 = vand.u32 2147483647, %v754_v16 }
 0x1d2   : > { %v964_v15 = vpop.eup %963  ;;  %301 = vperm.xlu1 %934, %v295_v6   ;;  %v756_v46 = vclamps-f32 %v490_v37, 10000.0 }
 0x1d3   : > { %v792_v34 = vsel %vm786_vm1, %v791_v31, %v753_v57  ;;  %v492_v35 = vmul.f32 %v964_v15, %v480_v29  ;;  %v819_v36 = vcvt.f32.s32 %v755_v32  ;;  %v813_v40 = vand.u32 2147483647, %v812_v33 }
 0x1d4   : > { %v296_v38 = vsub.f32 0.0, %v792_v34  ;;  %v298_v47 = vsub.f32 255.0, %v792_v34  ;;  %v822_v48 = vand.u32 2147483648, %v755_v32  ;;  %vm810_vm2 = vcmp.lt.f32.partialorder %v809_v42, 8388608.0 }
 0x1d5   : > { %v757_v43 = vclamps-f32 %v492_v35, 10000.0  ;;  %v820_v44 = vcvt.s32.f32 %v819_v36  ;;  %v815_v18 = vor.u32 %v814_v41, %v813_v40  ;;  %v817_v49 = vand.u32 2147483647, %v755_v32 }
 0x1d6   : > { %306 = vperm.xlu0 %935, %v296_v38   ;;  %313 = vperm.xlu1 %934, %v297_v39   ;;  %v843_v56 = vcvt.f32.s32 %v756_v46  ;;  %v846_v12 = vand.u32 2147483648, %v756_v46  ;;  %v841_v14 = vand.u32 2147483647, %v756_v46 }
 0x1d7   : > { %v851_v19 = vcvt.f32.s32 %v757_v43  ;;  %v821_v45 = vand.u32 2147483647, %v820_v44  ;;  %v816_v50 = vsel %vm810_vm2, %v815_v18, %v754_v16  ;;  %v849_v52 = vand.u32 2147483647, %v757_v43 }
 0x1d8   : > { %v854_v55 = vand.u32 2147483648, %v757_v43  ;;  %v408_v57 = vsub.f32 0.0, %v816_v50  ;;  %vm818_vm3 = vcmp.lt.f32.partialorder %v817_v49, 8388608.0  ;;  %v844_v9 = vcvt.s32.f32 %v843_v56 }
 0x1d9   : > { %v852_v24 = vcvt.s32.f32 %v851_v19  ;;  %v823_v53 = vor.u32 %v822_v48, %v821_v45  ;;  %vm850_vm4 = vcmp.lt.f32.partialorder %v849_v52, 8388608.0  ;;  %v410_v8 = vsub.f32 15.0, %v816_v50 }
 0x1da   : > { %318 = vperm.xlu1 %934, %v298_v47   ;;  %938 = vset.pattern.permute.xlu0 %v1067_v51  ;;  %v845_v7 = vand.u32 2147483647, %v844_v9  ;;  %vm842_vm5 = vcmp.lt.f32.partialorder %v841_v14, 8388608.0 }
 0x1db   : > { %v853_v54 = vand.u32 2147483647, %v852_v24  ;;  %v824_v60 = vsel %vm818_vm3, %v823_v53, %v755_v32 }
 0x1dc   : > { %v409_v63 = vsub.f32 0.0, %v824_v60  ;;  %v847_v13 = vor.u32 %v846_v12, %v845_v7  ;;  %v411_v16 = vsub.f32 15.0, %v824_v60 }
 0x1dd   : > { %v855_v58 = vor.u32 %v854_v55, %v853_v54 }
 0x1de   : > { %936 = vset.pattern.permute.xlu1 %v1068_v59  ;;  %v848_v17 = vsel %vm842_vm5, %v847_v13, %v756_v46 }
 0x1df   : > { %414 = vperm.xlu1 %936, %v408_v57   ;;  %v856_v61 = vsel %vm850_vm4, %v855_v58, %v757_v43  ;;  %v521_v22 = vsub.f32 0.0, %v848_v17  ;;  %v523_v23 = vsub.f32 3.0, %v848_v17 }
 0x1e0   : > { %v522_v62 = vsub.f32 0.0, %v856_v61  ;;  %v524_v26 = vsub.f32 3.0, %v856_v61 }
 0x1e2   : > { %532 = vperm.xlu0 %938, %v522_v62  }
 0x1e3   : > { %419 = vperm.xlu1 %936, %v409_v63  }
 0x1e6   : > { %940 = vset.pattern.permute.xlu0 %v1062_v25 }
 0x1e7   : > { %621 = vperm.xlu0 %940, %v1286_v10   ;;  %426 = vperm.xlu1 %936, %v410_v8  }
 0x1eb   : > { %431 = vperm.xlu1 %936, %v411_v16  }
 0x1ef   : > { %937 = vset.pattern.permute.xlu1 %v1067_v51 }
 0x1f0   : > { %527 = vperm.xlu1 %937, %v521_v22  }
 0x1f4   : > { %539 = vperm.xlu1 %937, %v523_v23  }
 0x1f6   : > { %v587_v15 = vpop.xlane.xlu0 %586 }
 0x1f7   : > { %v589_v59 = vmul.f32 0.0078125, %v587_v15 }
 0x1f8   : > { %544 = vperm.xlu1 %937, %v524_v26  }
 0x1fc   : > { %939 = vset.pattern.permute.xlu1 %v1062_v25 }
 0x1fd   : > { %616 = vperm.xlu1 %939, %v1284_v28  }
 0x1fe   : > { %v326_v25 = vpop.permute.xlu0 %325 }
 0x1ff   : > { %v585_v27 = vpop.xlane.xlu1 %584 }
 0x200   : > { %v588_v6 = vmul.f32 0.0078125, %v585_v27 }
 0x202   : > { %v758_v10 = vclamps-f32 %v588_v6, 10000.0  ;;  %v331_v34 = vpop.permute.xlu0 %330 }
 0x204   : > { %v1302_v11 = vsub.f32 %v1268_v21, %v758_v10 }
 0x206   : > { %vm598_vm6 = vcmp.lt.f32.partialorder %v1302_v11, 0.0  ;;  %v605_v29 = vpop.permute.xlu1 %604  ;;  %v284_v21 = vpop.permute.xlu0 %283  ;;  %vm596_vm15 = vcmp.gt.f32.partialorder %v1302_v11, 0.0 }
 0x207   : > { %v1305_v30 = vsel %vm598_vm6, %v605_v29, 0.0  ;;  %v291_v36 = vmul.f32 %v284_v21, %v1202_v1 }
 0x209   : > { %v795_v38 = vcvt.f32.s32 %v291_v36  ;;  %v798_v45 = vand.u32 2147483648, %v291_v36  ;;  %v793_v46 = vand.u32 2147483647, %v291_v36 }
 0x20a   : > { %v1307_v31 = vpop.permute.xlu1 %609 }
 0x20b   : > { %v796_v42 = vcvt.s32.f32 %v795_v38  ;;  %v397_v43 = vpop.permute.xlu0 %396  ;;  %vm794_vm7 = vcmp.lt.f32.partialorder %v793_v46, 8388608.0 }
 0x20c   : > { %v404_v24 = vmul.f32 %v397_v43, %v1199_v0 }
 0x20d   : > { %v797_v44 = vand.u32 2147483647, %v796_v42 }
 0x20e   : > { %v827_v53 = vcvt.f32.s32 %v404_v24  ;;  %v830_v17 = vand.u32 2147483648, %v404_v24  ;;  %v825_v23 = vand.u32 2147483647, %v404_v24 }
 0x20f   : > { %v1309_v32 = vpop.permute.xlu1 %438  ;;  %v799_v47 = vor.u32 %v798_v45, %v797_v44 }
 0x210   : > { %v515_v49 = vpop.permute.xlu0 %514  ;;  %v828_v62 = vcvt.s32.f32 %v827_v53  ;;  %vm826_vm10 = vcmp.lt.f32.partialorder %v825_v23, 8388608.0 }
 0x211   : > { %v800_v52 = vsel %vm794_vm7, %v799_v47, %v291_v36  ;;  %v518_v6 = vmul.f32 %v515_v49, %v1215_v4 }
 0x212   : > { %v829_v12 = vand.u32 2147483647, %v828_v62 }
 0x213   : > { %v1311_v33 = vpop.permute.xlu1 %443  ;;  %v867_v36 = vcvt.f32.s32 %v518_v6 }
 0x214   : > { %v831_v26 = vor.u32 %v830_v17, %v829_v12 }
 0x215   : > { %v868_v43 = vcvt.s32.f32 %v867_v36 }
 0x216   : > { %v832_v21 = vsel %vm826_vm10, %v831_v26, %v404_v24 }
 0x218   : > { %v1313_v28 = vpop.permute.xlu1 %551 }
 0x21c   : > { %v1315_v35 = vpop.permute.xlu1 %556 }
 0x221   : > { %v289_v37 = vpop.permute.xlu1 %288 }
 0x222   : > { %v292_v39 = vmul.f32 %v289_v37, %v1210_v3 }
 0x224   : > { %v803_v40 = vcvt.f32.s32 %v292_v39  ;;  %v806_v1 = vand.u32 2147483648, %v292_v39  ;;  %v801_v51 = vand.u32 2147483647, %v292_v39 }
 0x226   : > { %v402_v41 = vpop.permute.xlu1 %401  ;;  %v804_v18 = vcvt.s32.f32 %v803_v40  ;;  %vm802_vm8 = vcmp.lt.f32.partialorder %v801_v51, 8388608.0  ;;  %v865_v51 = vand.u32 2147483647, %v518_v6 }
 0x227   : > { %v405_v54 = vmul.f32 %v402_v41, %v1207_v2  ;;  %v759_v2 = vclamps-f32 %v589_v59, 10000.0 }
 0x228   : > { %v805_v48 = vand.u32 2147483647, %v804_v18  ;;  %vm866_vm14 = vcmp.lt.f32.partialorder %v865_v51, 8388608.0 }
 0x229   : > { %v835_v61 = vcvt.f32.s32 %v405_v54  ;;  %v595_v22 = vsub.f32 %v1265_v20, %v759_v2  ;;  %v838_v15 = vand.u32 2147483648, %v405_v54 }
 0x22a   : > { %v807_v3 = vor.u32 %v806_v1, %v805_v48 }
 0x22b   : > { %v510_v19 = vpop.permute.xlu1 %509  ;;  %v836_v14 = vcvt.s32.f32 %v835_v61  ;;  %vm599_vm9 = vcmp.lt.f32.partialorder %v595_v22, 0.0  ;;  %vm597_vm11 = vcmp.gt.f32.partialorder %v595_v22, 0.0 }
 0x22c   : > { %v808_v60 = vsel %vm802_vm8, %v807_v3, %v292_v39  ;;  %v517_v13 = vmul.f32 %v510_v19, %v1218_v5  ;;  %v613_v20 = vsel %vm599_vm9, %v1307_v31, 0.0  ;;  %v869_v31 = vand.u32 2147483647, %v868_v43 }
 0x22d   : > { %v837_v27 = vand.u32 2147483647, %v836_v14 }
 0x22e   : > { %v859_v10 = vcvt.f32.s32 %v517_v13  ;;  %v862_v47 = vand.u32 2147483648, %v517_v13  ;;  %v857_v48 = vand.u32 2147483647, %v517_v13 }
 0x22f   : > { %v839_v5 = vor.u32 %v838_v15, %v837_v27 }
 0x230   : > { %v860_v38 = vcvt.s32.f32 %v859_v10  ;;  %vm858_vm13 = vcmp.lt.f32.partialorder %v857_v48, 8388608.0 }
 0x232   : > { %v861_v19 = vand.u32 2147483647, %v860_v38 }
 0x234   : > { %v863_v49 = vor.u32 %v862_v47, %v861_v19 }
 0x236   : > { %v864_v3 = vsel %vm858_vm13, %v863_v49, %v517_v13 }
 0x24d   : > { %v302_v50 = vpop.permute.xlu1 %301 }
 0x24e   : > { %v309_v55 = vmax.f32 %v302_v50, %v800_v52  ;;  %v870_v50 = vand.u32 2147483648, %v518_v6 }
 0x250   : > { %v871_v52 = vor.u32 %v870_v50, %v869_v31 }
 0x251   : > { %v314_v56 = vpop.permute.xlu1 %313  ;;  %v307_v57 = vpop.permute.xlu0 %306 }
 0x252   : > { %v321_v58 = vmin.f32 %v314_v56, %v309_v55  ;;  %v310_v9 = vmax.f32 %v307_v57, %v808_v60  ;;  %v872_v55 = vsel %vm866_vm14, %v871_v52, %v518_v6 }
 0x254   : > { %v333_v0 = vmul.f32 %v326_v25, %v321_v58 }
 0x255   : > { %v319_v63 = vpop.permute.xlu1 %318 }
 0x256   : > { %335 = vst [vmem:[%s1323_s22] sm:$0xff] %v333_v0  ;;  %v322_v7 = vmin.f32 %v319_v63, %v310_v9 }
 0x258   : > { %v334_v8 = vmul.f32 %v331_v34, %v322_v7  ;;  %v833_v34 = vand.u32 2147483647, %v405_v54 }
 0x25a   : > { %336 = vst [vmem:[%s1323_s22 + $0x20] sm:$0xff] %v334_v8  ;;  %v415_v16 = vpop.permute.xlu1 %414  ;;  %vm834_vm12 = vcmp.lt.f32.partialorder %v833_v34, 8388608.0 }
 0x25b   : > { %v422_v37 = vmax.f32 %v415_v16, %v832_v21  ;;  %v840_v42 = vsel %vm834_vm12, %v839_v5, %v405_v54 }
 0x25d   : > { %v533_v29 = vpop.permute.xlu0 %532 }
 0x25e   : > { %v420_v25 = vpop.permute.xlu1 %419  ;;  %v536_v56 = vmax.f32 %v533_v29, %v872_v55 }
 0x25f   : > { %v423_v44 = vmax.f32 %v420_v25, %v840_v42 }
 0x262   : > { %v427_v39 = vpop.permute.xlu1 %426  ;;  %v622_v40 = vpop.permute.xlu0 %621 }
 0x263   : > { %v434_v4 = vmin.f32 %v427_v39, %v422_v37  ;;  %v625_v41 = vsel %vm597_vm11, %v622_v40, %v613_v20 }
 0x264   : > { %627 = vst [vmem:[%s1323_s22 + $0x38] sm:$0xff] %v625_v41 }
 0x265   : > { %v446_v18 = vmul.f32 %v1309_v32, %v434_v4 }
 0x266   : > { %v432_v45 = vpop.permute.xlu1 %431 }
 0x267   : > { %448 = vst [vmem:[%s1323_s22 + $0x8] sm:$0xff] %v446_v18  ;;  %v435_v46 = vmin.f32 %v432_v45, %v423_v44 }
 0x269   : > { %v447_v24 = vmul.f32 %v1311_v33, %v435_v46 }
 0x26b   : > { %449 = vst [vmem:[%s1323_s22 + $0x28] sm:$0xff] %v447_v24  ;;  %v528_v1 = vpop.permute.xlu1 %527 }
 0x26c   : > { %v535_v32 = vmax.f32 %v528_v1, %v864_v3 }
 0x26f   : > { %v540_v53 = vpop.permute.xlu1 %539 }
 0x270   : > { %v547_v54 = vmin.f32 %v540_v53, %v535_v32 }
 0x272   : > { %v559_v33 = vmul.f32 %v1313_v28, %v547_v54 }
 0x273   : > { %v545_v57 = vpop.permute.xlu1 %544 }
 0x274   : > { %561 = vst [vmem:[%s1323_s22 + $0x10] sm:$0xff] %v559_v33  ;;  %v548_v58 = vmin.f32 %v545_v57, %v536_v56 }
 0x276   : > { %v560_v59 = vmul.f32 %v1315_v35, %v548_v58  ;;  %635 = sbr.rel (!%p1131_p9) target bundleno = 662 (0x296), region = 36 }
 0x278   : > { %562 = vst [vmem:[%s1323_s22 + $0x30] sm:$0xff] %v560_v59  ;;  %v617_v60 = vpop.permute.xlu1 %616 }
 0x279   : > { %v624_v61 = vsel %vm596_vm15, %v617_v60, %v1305_v30 }
 0x27a   : > { %626 = vst [vmem:[%s1323_s22 + $0x18] sm:$0xff] %v624_v61 }
 0x27b   : > { %s1421_s24 = smov (!%p638_p10, %s637_s24), 2 }
 0x27c   : > { %s1347_s25 = sshll.u32 %s1421_s24, 9 }
 0x27d   : > { %s643_s27 = ssub.s32 1024, %s1347_s25 }
 0x27e   : > { %644 = vsyncadd %s629_s23, %s643_s27  ;;  %p764_p11 = scmp.ne.s32.totalorder %s1347_s25, 0  ;;  %s776_s29 = sshll.u32 %s1108_s13, 10 }
 0x27f   : > { %s1357_s4 = scalar_lea.hbm %s1407_s2, %s776_s29  ;;  %s650_s7 = sshll.u32 %s1323_s22, 4  ;;  %s1360_s7 = int_to_ptr.vmem [resolvable:$true] %s650_s7 }
 0x280   : > { %s991_s8 = scalar_lea.vmem %s1360_s7, %s1347_s25  ;;  %s1069_s19 = smov [#allocation5]  }
 0x281   : > { %p992_p9 = scmp.ne.s32.totalorder %s1360_s7, %s991_s8  ;;  %s995_s26 = sshll.u32 %s1069_s19, 4  ;;  %s996_s26 = int_to_ptr.vmem [resolvable:$false] %s995_s26 }
 0x282   : > { %s997_s13 = scalar_lea.vmem %s996_s26, 2048  ;;  %p998_p8 = scmp.lt.s32.totalorder %s1360_s7, %s996_s26 }
 0x283   : > { %p993_p13 = pnand %p992_p9, %p764_p11  ;;  %p999_p12 = scmp.lt.s32.totalorder %s997_s13, %s991_s8 }
 0x285   : > { %p994_p7 = pneg %p993_p13  ;;  %p1000_p0 = por %p999_p12, %p998_p8 }
 0x287   : > { %p1001_p1 = pnand %p1000_p0, %p994_p7 }
 0x289   : > { %1004 = shalt.err (!%p1001_p1)
}
 0x28a   : > { %s1005_s28 = scalar_lea.hbm %s1357_s4, %s1347_s25  ;;  %s1009_s14 = scalar_lea.hbm %s1407_s2, 1536 }
 0x28b   : > { %p1006_p3 = scmp.ne.s32.totalorder %s1357_s4, %s1005_s28  ;;  %p1010_p5 = scmp.lt.s32.totalorder %s1357_s4, %s1407_s2 }
 0x28c   : > { %p1011_p6 = scmp.lt.s32.totalorder %s1009_s14, %s1005_s28 }
 0x28d   : > { %p1007_p2 = pnand %p1006_p3, %p764_p11 }
 0x28e   : > { %p1012_p10 = por %p1011_p6, %p1010_p5 }
 0x28f   : > { %p1008_p4 = pneg %p1007_p2 }
 0x291   : > { %p1013_p9 = pnand %p1012_p10, %p1008_p4 }
 0x293   : > { %1016 = shalt.err (!%p1013_p9)
}
 0x294   : > { %s1070_s22 = smov 512   ;;  %s1071_s24 = smov 32  }
 0x295   : > { %656 = dma.vmem_to_hbm [thread:$0]  (%p764_p11), %s1360_s7, %s1347_s25, %s1357_s4, %s629_s23, %s1070_s22, %s1070_s22, %s1071_s24  }
 0x296 PF: > { %s665_s27 = sand.u32 1, %s1043_s9   ;;  %p1412_p13 = scmp.ne.s32.totalorder %s1411_s21, 0 }
 0x297   : > { %p1413_p7 = scmp.ge.s32.totalorder %s1055_s12, 2  ;;  %s666_s29 = scalar_lea.sflag [#allocation4], %s665_s27 }
 0x299   : > { %p876_p8 = pnand %p1413_p7, %p1412_p13 }
 0x29b   : > { %p877_p12 = pneg %p876_p8 }
 0x29d   : > { %1038 = dma.done.wait (%p877_p12), %s666_s29, 1024  }
 0x29e   : > { %1040 = vsyncadd (%p877_p12), %s666_s29, 4294966272  ;;  %p15_p0 = scmp.ge.s32.totalorder %s1112_s15, 4   ;;  %s1414_s9 = smov %s1047_s10 }
 0x29f   : > { %s1415_s10 = smov %s1051_s11  ;;  %s1416_s11 = smov %s1124_s18 }
 0x2a0   : > { %s1417_s12 = smov %s1112_s15  ;;  %17 = sbr.rel (!%p15_p0) target bundleno = 5 (0x5), region = 76 }
 0x2a5   :  { %671 = vsyncpa [#allocation3], 1 }
 0x2a6   :  { %673 = vsyncpa [#allocation3 + $0x1], 1 }
 0x2a7   :  { %674 = vsyncpa [#allocation4], 1 }
 0x2a8   :  { %676 = vsyncpa [#allocation4 + $0x1], 1 }

</bundles_post_ra>
